<compile_context>
chip_gen: v7x
topology: tpu7x:2x2x1
jax: 0.10.0
libtpu: 0.0.40
codegen_flags: <defaults>
</compile_context>

<pallas_src>
import functools
import math
import statistics

import jax
import jax.numpy as jnp
from jax.experimental import pallas as pl
from jax.experimental.pallas import tpu as pltpu


# ----------------------------------------------------------------------------
# Deterministic, in-script stand-in for the external `config` module used by
# the PyTorch code (synthetic values; not a checkpoint load).
# ----------------------------------------------------------------------------
class _Config:
    TRAIN_SET_LM_COUNT = {1: 1200, 31: 340}
    CLASS_BALANCE_BETA = 0.999
    TOTAL_TRAIN_SET_COUNT = 1.0 / 2000.0


config = _Config()
_EPS = 1e-06
_LANES = 128


def _get_weight(class_count):
    return ((1.0 - config.CLASS_BALANCE_BETA)
            / (1.0 - math.pow(config.CLASS_BALANCE_BETA, class_count))
            * config.TOTAL_TRAIN_SET_COUNT)


def _weight_map(label):
    # TODO(synk): string-label handling has no Pallas equivalent; stays host-side.
    if label == '1-present':
        return _get_weight(config.TRAIN_SET_LM_COUNT[1])
    if label == '8-present':
        return _get_weight(config.TRAIN_SET_LM_COUNT[31])
    if label == '1-and-8-present':
        w_1 = _get_weight(config.TRAIN_SET_LM_COUNT[1])
        w_8 = _get_weight(config.TRAIN_SET_LM_COUNT[31])
        return statistics.mean([w_1, w_8])
    return 1.17967


def _default_num_shards():
    """Shard count = TensorCores per chip (1 on v5e/v6e, 2 on dual-TC chips)."""
    try:
        kind = jax.devices()[0].device_kind.lower()
    except Exception:
        return 1
    if "lite" in kind or "v5e" in kind or "v6e" in kind:
        return 1
    if any(tag in kind for tag in ("v4", "v5p", "v6p", "v7", "7x")):
        return 2
    return 1


# ----------------------------------------------------------------------------
# Pallas kernel: per-shard resident (acc_rows, 128) partial sum of squared
# differences.  Fast unmasked path for full tiles; masked path only for the
# single partial last tile; dead (shard-padding) tiles skipped entirely.
# ----------------------------------------------------------------------------
def _cbrmse_partial_kernel(x_ref, y_ref, o_ref, *, rows_total, acc_rows):
    block_rows, lanes = x_ref.shape
    s = pl.program_id(0)                       # shard ("parallel" axis)
    i = pl.program_id(1)                       # tile within shard ("arbitrary")
    t = s * pl.num_programs(1) + i             # logical tile index

    @pl.when(i == 0)
    def _():
        o_ref[...] = jnp.zeros_like(o_ref)

    n_full = rows_total // block_rows          # static python ints
    tail_rows = rows_total - n_full * block_rows

    def _accum(sq):
        # Reduce over vreg groups only (pure VPU adds, no cross-lane XLU);
        # acc_rows=32 keeps several independent accumulator chains live.
        o_ref[...] += jnp.sum(
            sq.reshape(block_rows // acc_rows, acc_rows, lanes), axis=0)

    # Fast path: fully-valid tiles, no masking at all.
    @pl.when(t < n_full)
    def _():
        d = x_ref[...].astype(jnp.float32) - y_ref[...].astype(jnp.float32)
        _accum(d * d)

    if tail_rows:
        # Masked path: only the single partial last tile.  Pallas pads the
        # out-of-range rows of a partial block with unspecified data, so the
        # invalid rows must be zeroed before squaring.
        @pl.when(t == n_full)
        def _():
            d = x_ref[...].astype(jnp.float32) - y_ref[...].astype(jnp.float32)
            row_ids = jax.lax.broadcasted_iota(
                jnp.int32, (block_rows, lanes), 0)
            d = jnp.where(row_ids < tail_rows, d, jnp.float32(0.0))
            _accum(d * d)
    # Dead tiles (t >= tiles_total, only possible when shards pad the tile
    # count) fall through both pl.when guards and contribute nothing.


@functools.partial(jax.jit, static_argnames=("block_rows_target", "num_shards"))
def _cb_rmse_core(x, y, w_mean, eps, *, block_rows_target, num_shards):
    lanes = _LANES
    total_n = x.size
    flat_x = x.reshape(-1)                     # contiguous reshape -> bitcast
    flat_y = y.reshape(-1)

    rem = total_n % (8 * lanes)                # ragged tail (< 1024 elements)
    n_main = total_n - rem

    ssq_tail = jnp.float32(0.0)
    if rem:
        # Tiny jnp epilogue for the unaligned remainder (fused under this jit).
        dt = (flat_x[n_main:].astype(jnp.float32)
              - flat_y[n_main:].astype(jnp.float32))
        ssq_tail = jnp.sum(dt * dt)

    if n_main:
        rows = n_main // lanes                 # multiple of 8
        # No padded concatenate: aligned case is a free reshape; unaligned
        # case takes a prefix slice (still far cheaper than the old pad+concat).
        x2d = (flat_x[:n_main] if rem else flat_x).reshape(rows, lanes)
        y2d = (flat_y[:n_main] if rem else flat_y).reshape(rows, lanes)

        if block_rows_target is None:
            # dtype-aware ~2 MiB per input block (4096 rows f32, 8192 bf16).
            block_rows_target = max(
                8, (2 * 1024 * 1024) // (lanes * x.dtype.itemsize))
        block_rows = min(int(block_rows_target), rows)   # multiple of 8
        acc_rows = 32 if block_rows % 32 == 0 else 8

        tiles_total = pl.cdiv(rows, block_rows)
        ns = max(1, min(int(num_shards), tiles_total))
        tiles_per_shard = pl.cdiv(tiles_total, ns)

        def in_map(s, i):
            # Clamp so dead (shard-padding) tiles re-read the last block; the
            # kernel skips them via scalar pl.when guards.
            t = s * tiles_per_shard + i
            return (jnp.minimum(t, tiles_total - 1), 0)

        kernel = functools.partial(
            _cbrmse_partial_kernel, rows_total=rows, acc_rows=acc_rows)

        partials = pl.pallas_call(
            kernel,
            out_shape=jax.ShapeDtypeStruct((ns * acc_rows, lanes), jnp.float32),
            grid_spec=pltpu.PrefetchScalarGridSpec(
                num_scalar_prefetch=0,
                grid=(ns, tiles_per_shard),
                in_specs=[
                    pl.BlockSpec((block_rows, lanes), in_map),
                    pl.BlockSpec((block_rows, lanes), in_map),
                ],
                out_specs=pl.BlockSpec((acc_rows, lanes), lambda s, i: (s, 0)),
            ),
            compiler_params=pltpu.CompilerParams(
                dimension_semantics=("parallel", "arbitrary")),
        )(x2d, y2d)
        ssq_main = jnp.sum(partials)           # tiny, fused under this jit
    else:
        ssq_main = jnp.float32(0.0)

    mse = (ssq_main + ssq_tail) / jnp.float32(total_n)
    return w_mean * jnp.sqrt(mse + eps)


def cb_rmse_loss(x, y, labels, *, eps=_EPS, block_rows_target=None,
                 num_shards=None):
    """x, y: same-shape float arrays (e.g. NCHW). labels: list of python strings."""
    assert x.shape == y.shape
    # Host-side scalar: mean of the per-label weights (strings stay host-side).
    w_mean = float(statistics.mean([_weight_map(l) for l in labels]))
    if num_shards is None:
        num_shards = _default_num_shards()
    return _cb_rmse_core(x, y, jnp.float32(w_mean), jnp.float32(eps),
                         block_rows_target=block_rows_target,
                         num_shards=int(num_shards))


# ----------------------------------------------------------------------------
if __name__ == "__main__":
    key = jax.random.PRNGKey(0)

    def reference(x, y, labels, eps=_EPS):
        w = jnp.asarray([_weight_map(l) for l in labels], dtype=jnp.float32)
        diff = x.astype(jnp.float32) - y.astype(jnp.float32)
        return jnp.mean(w * jnp.sqrt(jnp.mean(diff * diff) + eps))

    cases = [
        # (shape, dtype, labels, block_rows_target, num_shards)
        # primary small case matching the module's NCHW convention
        ((2, 4, 16, 16), jnp.float32, ['1-present', '8-present'], None, None),
        # bf16 inputs: exercises dtype-aware block sizing + in-kernel f32 cast
        ((2, 4, 16, 16), jnp.bfloat16, ['1-and-8-present'], None, None),
        # < 1024 elements: degenerate pure-jnp path (kernel skipped)
        ((2, 3, 10, 10), jnp.float32,
         ['1-and-8-present', 'unknown-label'], None, None),
        # numel % 1024 != 0: kernel on aligned prefix + jnp tail epilogue
        ((2, 5, 37, 17), jnp.float32, ['1-present', '8-present'], None, None),
        # small forced block + 2 shards: multi-tile accumulation, masked
        # partial last tile, and a dead shard-padding tile
        ((3, 8, 128, 128), jnp.float32,
         ['1-present', '8-present', '1-and-8-present'], 640, 2),
    ]

    for idx, (shape, dtype, labels, brt, ns) in enumerate(cases):
        kx, ky = jax.random.split(jax.random.fold_in(key, idx))
        x = jax.random.normal(kx, shape, dtype=dtype)
        y = jax.random.normal(ky, shape, dtype=dtype)
        loss = jax.block_until_ready(
            cb_rmse_loss(x, y, labels, block_rows_target=brt, num_shards=ns))
        ref = jax.block_until_ready(reference(x, y, labels))
        assert jnp.allclose(loss, ref, rtol=1e-4, atol=1e-6), \
            (shape, dtype, float(loss), float(ref))

    print("KERNEL_OK")
</pallas_src>

<mosaic_0001>
module attributes {stable_mosaic.version = 11 : i64} {
  func.func @_cbrmse_partial_kernel(%arg0: i32, %arg1: i32, %arg2: memref<16x128xf32, #tpu.memory_space<vmem>>, %arg3: memref<16x128xf32, #tpu.memory_space<vmem>>, %arg4: memref<8x128xf32, #tpu.memory_space<vmem>>) attributes {dimension_semantics = [#tpu.dimension_semantics<parallel>, #tpu.dimension_semantics<arbitrary>], iteration_bounds = array<i64: 1, 1>, scalar_prefetch = 0 : i64, scratch_operands = 0 : i64, tpu.core_type = #tpu.core_type<tc>, window_params = [{transform_indices = @transform_0, window_bounds = array<i64: 16, 128>}, {transform_indices = @transform_1, window_bounds = array<i64: 16, 128>}, {transform_indices = @transform_2, window_bounds = array<i64: 8, 128>}]} {
    %c1_i32 = arith.constant 1 : i32
    %0 = arith.muli %arg0, %c1_i32 : i32
    %1 = arith.addi %0, %arg1 : i32
    %c0_i32 = arith.constant 0 : i32
    %2 = arith.cmpi eq, %arg1, %c0_i32 : i32
    %3 = arith.extui %2 : i1 to i32
    %c0_i32_0 = arith.constant 0 : i32
    %4 = arith.cmpi ne, %3, %c0_i32_0 : i32
    scf.if %4 {
      %cst = arith.constant 0.000000e+00 : f32
      %8 = vector.broadcast %cst : f32 to vector<8x128xf32>
      %c0 = arith.constant 0 : index
      %c0_3 = arith.constant 0 : index
      %9 = vector.load %arg4[%c0, %c0_3] : memref<8x128xf32, #tpu.memory_space<vmem>>, vector<8x128xf32>
      tpu.vector_store %arg4[%c0, %c0_3], %8 {strides = array<i32>} : memref<8x128xf32, #tpu.memory_space<vmem>>, vector<8x128xf32>,
    } else {
    }
    %c1_i32_1 = arith.constant 1 : i32
    %5 = arith.cmpi slt, %1, %c1_i32_1 : i32
    %6 = arith.extui %5 : i1 to i32
    %c0_i32_2 = arith.constant 0 : i32
    %7 = arith.cmpi ne, %6, %c0_i32_2 : i32
    scf.if %7 {
      %c0 = arith.constant 0 : index
      %c0_3 = arith.constant 0 : index
      %8 = vector.load %arg2[%c0, %c0_3] : memref<16x128xf32, #tpu.memory_space<vmem>>, vector<16x128xf32>
      %c0_4 = arith.constant 0 : index
      %c0_5 = arith.constant 0 : index
      %9 = vector.load %arg3[%c0_4, %c0_5] : memref<16x128xf32, #tpu.memory_space<vmem>>, vector<16x128xf32>
      %10 = arith.subf %8, %9 : vector<16x128xf32>
      %11 = arith.mulf %10, %10 : vector<16x128xf32>
      %c0_6 = arith.constant 0 : index
      %c0_7 = arith.constant 0 : index
      %12 = vector.load %arg4[%c0_6, %c0_7] : memref<8x128xf32, #tpu.memory_space<vmem>>, vector<8x128xf32>
      %13 = vector.shape_cast %11 : vector<16x128xf32> to vector<2x8x128xf32>
      %cst = arith.constant dense<0.000000e+00> : vector<8x128xf32>
      %14 = vector.multi_reduction <add>, %13, %cst [0] : vector<2x8x128xf32> to vector<8x128xf32>
      %15 = arith.addf %12, %14 : vector<8x128xf32>
      %c0_8 = arith.constant 0 : index
      %c0_9 = arith.constant 0 : index
      %16 = vector.load %arg4[%c0_8, %c0_9] : memref<8x128xf32, #tpu.memory_space<vmem>>, vector<8x128xf32>
      tpu.vector_store %arg4[%c0_8, %c0_9], %15 {strides = array<i32>} : memref<8x128xf32, #tpu.memory_space<vmem>>, vector<8x128xf32>,
    } else {
    }
    return
  }
  func.func @transform_0(%arg0: i32, %arg1: i32) -> (i32, i32) {
    %c1_i32 = arith.constant 1 : i32
    %0 = arith.muli %arg0, %c1_i32 : i32
    %1 = arith.addi %0, %arg1 : i32
    %c0_i32 = arith.constant 0 : i32
    %2 = arith.minsi %1, %c0_i32 : i32
    %c0_i32_0 = arith.constant 0 : i32
    %c0_i32_1 = arith.constant 0 : i32
    return %2, %c0_i32_0 : i32, i32
  }
  func.func @transform_1(%arg0: i32, %arg1: i32) -> (i32, i32) {
    %c1_i32 = arith.constant 1 : i32
    %0 = arith.muli %arg0, %c1_i32 : i32
    %1 = arith.addi %0, %arg1 : i32
    %c0_i32 = arith.constant 0 : i32
    %2 = arith.minsi %1, %c0_i32 : i32
    %c0_i32_0 = arith.constant 0 : i32
    %c0_i32_1 = arith.constant 0 : i32
    return %2, %c0_i32_0 : i32, i32
  }
  func.func @transform_2(%arg0: i32, %arg1: i32) -> (i32, i32) {
    %c0_i32 = arith.constant 0 : i32
    %c0_i32_0 = arith.constant 0 : i32
    return %arg0, %c0_i32 : i32, i32
  }
}

</mosaic_0001>

<bundles_post_ra>
// kernel: _cb_rmse_core.1
= control target key start
LH: loop header
LB: loop body
LE: loop exit
PB: predicated region body
PF: predicated region fallthrough
CT: control target
= control target key end

     0   :  { %s144_s0 = inlined_call_operand.vmem [shape: f32[16,128], index: 0, kind: input, shape index: {}]   ;;  %s145_s1 = inlined_call_operand.vmem [shape: f32[16,128], index: 1, kind: input, shape index: {}]   ;;  %s146_s2 = inlined_call_operand.vmem [shape: f32[8,128], index: 2, kind: output, shape index: {}]  }
   0x1   :  { %v85_v0 = vld [vmem:[%s144_s0] sm:$0xff]  ;;  %v86_v1 = vld [vmem:[%s144_s0 + $0x8] sm:$0xff] }
   0x2   :  { %v87_v2 = vld [vmem:[%s145_s1] sm:$0xff]  ;;  %v88_v3 = vld [vmem:[%s145_s1 + $0x8] sm:$0xff] }
   0x3   :  { %v89_v4 = vsub.f32 %v85_v0, %v87_v2  ;;  %v90_v5 = vsub.f32 %v86_v1, %v88_v3 }
   0x5   :  { %v91_v6 = vmul.f32 %v89_v4, %v89_v4  ;;  %v92_v7 = vmul.f32 %v90_v5, %v90_v5 }
   0x7   :  { %v94_v8 = vadd.f32 %v92_v7, %v91_v6 }
   0x9   :  { %96 = vst [vmem:[%s146_s2] sm:$0xff] %v94_v8 }

</bundles_post_ra>
